<compile_context>
chip_gen: v6e
topology: v6e:2x2x1
jax: 0.10.0
libtpu: 0.0.40
codegen_flags: <defaults>
</compile_context>

<pallas_src>
import functools

import jax
import jax.numpy as jnp
from jax.experimental import pallas as pl
from jax.experimental.pallas import tpu as pltpu


def _round_up(x, m):
    return ((x + m - 1) // m) * m


def mlp_kernel(p_ref, xt_ref, ot_ref, *, s_size, h_size, h_al, a_size):
    # Packed parameter buffer (pinned in VMEM across the whole grid):
    #   p[0:h,           0:s+1 ] = [W1 | b1]   (h, s+1)   nn.Linear fc1.weight/bias
    #   p[h_al:h_al+a,   0:h   ] = W2          (a, h)     nn.Linear fc2.weight
    #   p[h_al:h_al+a,   h:h+1 ] = b2          (a, 1)
    # h_al = round_up(h, 8) keeps the W2/b2 slice on an 8-sublane boundary.
    w1b1 = p_ref[0:h_size, 0:s_size + 1]                      # (h, s+1)
    w2 = p_ref[h_al:h_al + a_size, 0:h_size]                  # (a, h)
    b2 = p_ref[h_al:h_al + a_size, h_size:h_size + 1]         # (a, 1)

    xt = xt_ref[...]          # (s+1, TM): batch on lanes, last row == 1 (b1 fold)

    # fc1 (transposed, bias folded): (h, s+1) @ (s+1, TM) -> relu
    ht = jnp.maximum(
        jnp.dot(w1b1, xt, preferred_element_type=jnp.float32), 0.0)   # (h, TM)

    # fc2 (transposed): (a, h) @ (h, TM) + (a, 1) -> tanh
    yt = jnp.dot(w2, ht, preferred_element_type=jnp.float32) + b2      # (a, TM)
    ot_ref[...] = jnp.tanh(yt).astype(ot_ref.dtype)                    # lane-dense


def pack_params(fc1_w, fc1_b, fc2_w, fc2_b):
    """Pack nn.Linear-layout params. Call ONCE per weight update, not per forward.

    fc1_w: (h_size, s_size)   torch nn.Linear .weight layout (out, in)
    fc1_b: (h_size,)
    fc2_w: (a_size, h_size)
    fc2_b: (a_size,)
    """
    h_size, s_size = fc1_w.shape
    a_size = fc2_w.shape[0]
    h_al = _round_up(h_size, 8)                 # sublane-aligned start for W2/b2
    p_rows = _round_up(h_al + a_size, 8)
    p_cols = _round_up(max(s_size + 1, h_size + 1), 128)

    packed = jnp.zeros((p_rows, p_cols), jnp.float32)
    packed = packed.at[0:h_size, 0:s_size].set(jnp.asarray(fc1_w, jnp.float32))
    packed = packed.at[0:h_size, s_size].set(jnp.asarray(fc1_b, jnp.float32))
    packed = packed.at[h_al:h_al + a_size, 0:h_size].set(
        jnp.asarray(fc2_w, jnp.float32))
    packed = packed.at[h_al:h_al + a_size, h_size].set(
        jnp.asarray(fc2_b, jnp.float32))
    meta = dict(s_size=s_size, h_size=h_size, h_al=h_al, a_size=a_size)
    return packed, meta


def _pick_tm(B):
    # >= 128 lanes; cap at 2048 (the f32 (h, TM) hidden tile is TM/64 vregs);
    # for B > 128 aim for >= 2 grid steps so v7x's 2 TCs both get work.
    if B <= 128:
        return 128
    return int(min(2048, _round_up(-(-B // 2), 128)))


@functools.partial(
    jax.jit, static_argnames=("s_size", "h_size", "h_al", "a_size", "tm"))
def _agent_forward_packed(x, packed, *, s_size, h_size, h_al, a_size, tm):
    B = x.shape[0]
    b_pad = pl.cdiv(B, tm) * tm

    # Single pad builds the whole activation tile: transpose (batch -> lanes),
    # one extra row of ones for the folded b1, and lane padding up to the tile.
    # Pad value 1.0 serves the bias row; padded batch columns are sliced off.
    xt = jnp.pad(x.T.astype(jnp.float32), ((0, 1), (0, b_pad - B)),
                 constant_values=1.0)                       # (s+1, b_pad)

    kernel = functools.partial(
        mlp_kernel, s_size=s_size, h_size=h_size, h_al=h_al, a_size=a_size)

    out_t = pl.pallas_call(
        kernel,
        out_shape=jax.ShapeDtypeStruct((a_size, b_pad), jnp.float32),
        grid=(b_pad // tm,),
        in_specs=[
            # params: constant index_map -> fetched once, pinned in VMEM
            pl.BlockSpec(packed.shape, lambda i: (0, 0)),
            # activations: stream tm batch lanes per grid step
            pl.BlockSpec((s_size + 1, tm), lambda i: (0, i)),
        ],
        out_specs=pl.BlockSpec((a_size, tm), lambda i: (0, i)),
        compiler_params=pltpu.CompilerParams(
            dimension_semantics=("parallel",)),
    )(packed, xt)

    # back to the module's (B, a_size) layout; drop batch padding
    return out_t[:, :B].T


def agent_forward(x, packed, meta, tm=None):
    """Forward pass given an already-packed parameter buffer (see pack_params)."""
    if tm is None:
        tm = _pick_tm(x.shape[0])
    return _agent_forward_packed(x, packed, tm=tm, **meta)


def reference_forward(x, fc1_w, fc1_b, fc2_w, fc2_b):
    # nn.Linear semantics: y = x @ W^T + b
    h = jnp.maximum(x @ fc1_w.T + fc1_b, 0.0)
    return jnp.tanh(h @ fc2_w.T + fc2_b)


if __name__ == "__main__":
    # Module-implied sizes: s_size = observation_space.shape[0] (CartPole: 4),
    # h_size = 16, a_size = 2.
    s_size, h_size, a_size = 4, 16, 2

    key = jax.random.PRNGKey(0)
    k_x, k_x2, k_w1, k_b1, k_w2, k_b2 = jax.random.split(key, 6)

    # nn.Linear (out, in) layout parameters
    fc1_w = 0.1 * jax.random.normal(k_w1, (h_size, s_size), dtype=jnp.float32)
    fc1_b = 0.1 * jax.random.normal(k_b1, (h_size,), dtype=jnp.float32)
    fc2_w = 0.1 * jax.random.normal(k_w2, (a_size, h_size), dtype=jnp.float32)
    fc2_b = 0.1 * jax.random.normal(k_b2, (a_size,), dtype=jnp.float32)

    # Pack ONCE (hot-path forwards reuse this buffer).
    packed, meta = pack_params(fc1_w, fc1_b, fc2_w, fc2_b)

    # Tiny batch (RL rollout step): tm = 128, grid = (1,)
    x_small = jax.random.normal(k_x, (2, s_size), dtype=jnp.float32)
    out_small = agent_forward(x_small, packed, meta)
    jax.block_until_ready(out_small)
    ref_small = reference_forward(x_small, fc1_w, fc1_b, fc2_w, fc2_b)
    assert out_small.shape == (2, a_size)
    assert jnp.allclose(out_small, ref_small, atol=1e-5, rtol=1e-5)

    # Larger batch: tm = 256, grid = (2,) -> exercises the multi-step /
    # megacore-parallel path and the lane-padding slice-off.
    x_big = jax.random.normal(k_x2, (300, s_size), dtype=jnp.float32)
    out_big = agent_forward(x_big, packed, meta)
    jax.block_until_ready(out_big)
    ref_big = reference_forward(x_big, fc1_w, fc1_b, fc2_w, fc2_b)
    assert out_big.shape == (300, a_size)
    assert jnp.allclose(out_big, ref_big, atol=1e-5, rtol=1e-5)

    # TODO(synk): Agent.evaluate / set_weights are host-side RL rollout logic
    # (gym env stepping, numpy weight reshaping); set_weights maps to a single
    # pack_params() call here, the env loop stays on host.
    print("KERNEL_OK")
</pallas_src>

<mosaic_0001>
module attributes {stable_mosaic.version = 11 : i64} {
  func.func @mlp_kernel(%arg0: i32, %arg1: memref<24x128xf32, #tpu.memory_space<vmem>>, %arg2: memref<5x128xf32, #tpu.memory_space<vmem>>, %arg3: memref<2x128xf32, #tpu.memory_space<vmem>>) attributes {dimension_semantics = [#tpu.dimension_semantics<parallel>], iteration_bounds = array<i64: 1>, scalar_prefetch = 0 : i64, scratch_operands = 0 : i64, tpu.core_type = #tpu.core_type<tc>, window_params = [{pipeline_mode = #tpu.pipeline_mode<synchronous>, transform_indices = @transform_0, window_bounds = array<i64: 24, 128>}, {transform_indices = @transform_1, window_bounds = array<i64: 5, 128>}, {transform_indices = @transform_2, window_bounds = array<i64: 2, 128>}]} {
    %c0 = arith.constant 0 : index
    %c0_0 = arith.constant 0 : index
    %0 = vector.load %arg1[%c0, %c0_0] : memref<24x128xf32, #tpu.memory_space<vmem>>, vector<16x5xf32>
    %c16 = arith.constant 16 : index
    %c0_1 = arith.constant 0 : index
    %1 = vector.load %arg1[%c16, %c0_1] : memref<24x128xf32, #tpu.memory_space<vmem>>, vector<2x16xf32>
    %c16_2 = arith.constant 16 : index
    %c16_3 = arith.constant 16 : index
    %2 = vector.load %arg1[%c16_2, %c16_3] : memref<24x128xf32, #tpu.memory_space<vmem>>, vector<2x1xf32>
    %c0_4 = arith.constant 0 : index
    %c0_5 = arith.constant 0 : index
    %3 = vector.load %arg2[%c0_4, %c0_5] : memref<5x128xf32, #tpu.memory_space<vmem>>, vector<5x128xf32>
    %cst = arith.constant dense<0.000000e+00> : vector<16x128xf32>
    %4 = tpu.matmul %0, %3, %cst {dimension_numbers = #tpu.dot_dimension_numbers<[1], [0], [0], [1], [0, 0, 1, 1], [], []>} : vector<16x5xf32>, vector<5x128xf32>, vector<16x128xf32> -> vector<16x128xf32>
    %cst_6 = arith.constant 0.000000e+00 : f32
    %5 = vector.broadcast %cst_6 : f32 to vector<16x128xf32>
    %6 = arith.maximumf %4, %5 : vector<16x128xf32>
    %cst_7 = arith.constant dense<0.000000e+00> : vector<2x128xf32>
    %7 = tpu.matmul %1, %6, %cst_7 {dimension_numbers = #tpu.dot_dimension_numbers<[1], [0], [0], [1], [0, 0, 1, 1], [], []>} : vector<2x16xf32>, vector<16x128xf32>, vector<2x128xf32> -> vector<2x128xf32>
    %8 = vector.broadcast %2 : vector<2x1xf32> to vector<2x128xf32>
    %9 = arith.addf %7, %8 : vector<2x128xf32>
    %10 = math.tanh %9 : vector<2x128xf32>
    %c0_8 = arith.constant 0 : index
    %c0_9 = arith.constant 0 : index
    %11 = vector.load %arg3[%c0_8, %c0_9] : memref<2x128xf32, #tpu.memory_space<vmem>>, vector<2x128xf32>
    tpu.vector_store %arg3[%c0_8, %c0_9], %10 {strides = array<i32>} : memref<2x128xf32, #tpu.memory_space<vmem>>, vector<2x128xf32>,
    return
  }
  func.func @transform_0(%arg0: i32) -> (i32, i32) {
    %c0_i32 = arith.constant 0 : i32
    %c0_i32_0 = arith.constant 0 : i32
    %c0_i32_1 = arith.constant 0 : i32
    return %c0_i32, %c0_i32_0 : i32, i32
  }
  func.func @transform_1(%arg0: i32) -> (i32, i32) {
    %c0_i32 = arith.constant 0 : i32
    %c0_i32_0 = arith.constant 0 : i32
    return %c0_i32, %arg0 : i32, i32
  }
  func.func @transform_2(%arg0: i32) -> (i32, i32) {
    %c0_i32 = arith.constant 0 : i32
    %c0_i32_0 = arith.constant 0 : i32
    return %c0_i32, %arg0 : i32, i32
  }
}

</mosaic_0001>

<bundles_post_ra>
// kernel: _agent_forward_packed.1
= control target key start
LH: loop header
LB: loop body
LE: loop exit
PB: predicated region body
PF: predicated region fallthrough
CT: control target
= control target key end

     0   :  { %7 = vsyncpa [#allocation3], 0  ;;  %s255_s9 = smov [#allocation2]   ;;  %s285_s0 = inlined_call_operand.hbm [shape: f32[24,128], index: 0, kind: input, shape index: {}]   ;;  %s286_s1 = inlined_call_operand.vmem [shape: f32[5,128], index: 1, kind: input, shape index: {}]   ;;  %s287_s2 = inlined_call_operand.vmem [shape: f32[2,128], index: 2, kind: output, shape index: {}]  }
   0x1   :  { %s13_s10 = sshll.u32 %s255_s9, 4  ;;  %s14_s10 = int_to_ptr.vmem [resolvable:$true] %s13_s10 }
   0x2   :  { %s241_s11 = scalar_lea.vmem %s14_s10, 384  ;;  %p246_p1 = scmp.lt.s32.totalorder %s14_s10, %s14_s10 }
   0x3   :  { %p242_p0 = scmp.ne.s32.totalorder %s14_s10, %s241_s11  ;;  %p247_p2 = scmp.lt.s32.totalorder %s241_s11, %s241_s11 }
   0x5   :  { %p248_p3 = por %p247_p2, %p246_p1 }
   0x7   :  { %p249_p4 = pnand %p248_p3, %p242_p0 }
   0x9   :  { %252 = shalt.err (!%p249_p4)
}
   0xa   :  { %s256_s12 = smov 128   ;;  %s257_s13 = smov 8  }
   0xb   :  { %19 = dma.hbm_to_vmem [thread:$0]  %s285_s0, 384, %s14_s10, [#allocation3], %s256_s12, %s256_s12, %s257_s13  }
   0xc   :  { %253 = dma.done.wait [#allocation3], 384  }
   0xd   :  { %254 = vsyncadd [#allocation3], 4294966912  ;;  %vm36_vm0 = vcmask 1044480   ;;  %vm29_vm1 = vcmask 39936   ;;  %v28_v0 = vld [vmem:[%s286_s1] sm:$0x1f] }
   0xe   :  { %v25_v1 = vld [vmem:[#allocation2] sm:$0xff]  ;;  %v26_v2 = vld [vmem:[#allocation2 + $0x8] sm:$0xff]  ;;  %212 = vmatprep.subr.msk.mxu0 %vm36_vm0, %v28_v0  ;;  %v258_v3 = vmov 0.0   ;;  %vm259_vm2 = vmmov 0   ;;  %v27_v4 = vld [vmem:[#allocation2 + $0x10] sm:$0x3] }
   0xf   :  { %214 = vmatprep.mubr.msk.f32.mxu0 %vm29_vm1, %v25_v1  ;;  %213 = vmatpush3.msk.msra.mxu0 %vm36_vm0, %v28_v0  ;;  %v260_v5 = vmov 16   ;;  %vm122_vm3 = vcmask 130048  }
  0x10   :  { %215 = vmatmul.mubr.msk.f32.vlgmr.msra.gmra.mxu0 %vm29_vm1, %v26_v2  ;;  %217 = vmatprep.subr.mxu1 %v258_v3 }
  0x11   :  { %221 = vmatprep.mubr.msk.f32.mxu1 %vm259_vm2, %v258_v3  ;;  %230 = vset.pattern.permute.xlu0 %v260_v5 }
  0x12   :  { %119 = vperm.xlu0 %230, %v27_v4  }
  0x8d   :  { %v120_v10 = vpop.permute.xlu0 %119 }
  0xd0   :  { %v216_v6 = vpop.f32.mrf.mxu0 }
  0xd1   :  { %v116_v7 = vmax.f32 %v216_v6, 0.0 }
  0xd2   :  { %v106_v8 = vpop.f32.mrf.mxu0 }
  0xd3   :  { %v115_v9 = vmax.f32 %v106_v8, 0.0  ;;  %218 = vmatpush3.msra.mxu1 %v116_v7 }
  0xd4   :  { %219 = vmatprep.subr.mxu1 %v258_v3 }
  0xd5   :  { %220 = vmatpush3.msra.mxu1 %v115_v9 }
  0xd6   :  { %222 = vmatmul.mubr.msk.f32.vlgmr.msra.gmra.mxu1 %vm122_vm3, %v27_v4 }
 0x196   :  { %v191_v11 = vpop.f32.mrf.mxu1 }
 0x197   :  { %v192_v12 = vadd.f32 %v191_v11, %v120_v10 }
 0x198   :  { %v223_v13 = vpop.f32.mrf.mxu1 }
 0x199   :  { %231 = vtanh.f32 %v192_v12 }
 0x1a6   :  { %v232_v14 = vpop.eup %231 }
 0x1a7   :  { %196 = vst [vmem:[%s287_s2] sm:$0x3] %v232_v14 }
 0x1a8   :  { %201 = vsyncpa [#allocation3], 1 }

</bundles_post_ra>
